<compile_context>
chip_gen: v7x
topology: tpu7x:2x2x1
jax: 0.10.0
libtpu: 0.0.40
codegen_flags: <defaults>
</compile_context>

<pallas_src>
import functools
import math

import jax
import jax.numpy as jnp
from jax.experimental import pallas as pl
from jax.experimental.pallas import tpu as pltpu

SQRT2 = math.sqrt(2.0)
INV_SQRT2 = 1.0 / math.sqrt(2.0)
NEG_SLOPE = 0.2


# --------------------------------------------------------------------------- Pallas kernel

@functools.lru_cache(maxsize=None)
def _make_matmul_kernel(has_bias, fused_lrelu, has_residual):
    """out = epilogue(A @ B); epilogue = [+bias] -> [leaky_relu(.)*sqrt(2)]
    -> [(. + residual) * 1/sqrt(2)], applied once on the last K step."""

    def kernel(*refs):
        it = iter(refs)
        a_ref = next(it)
        b_ref = next(it)
        bias_ref = next(it) if has_bias else None
        res_ref = next(it) if has_residual else None
        out_ref = next(it)
        acc_ref = next(it)

        @pl.when(pl.program_id(2) == 0)
        def _init():
            acc_ref[...] = jnp.zeros_like(acc_ref)

        acc_ref[...] += jnp.dot(a_ref[...], b_ref[...],
                                preferred_element_type=jnp.float32)

        @pl.when(pl.program_id(2) == pl.num_programs(2) - 1)
        def _epilogue():
            x = acc_ref[...]
            if has_bias:
                x = x + bias_ref[...].astype(jnp.float32)
            if fused_lrelu:
                x = jnp.where(x >= 0.0, x, NEG_SLOPE * x) * SQRT2
            if has_residual:
                x = (x + res_ref[...].astype(jnp.float32)) * INV_SQRT2
            out_ref[...] = x.astype(out_ref.dtype)

    return kernel


# --------------------------------------------------------------------------- tiling helpers

def _hw_budgets():
    """(block_budget_bytes, vmem_limit_bytes) — generation aware (perf review)."""
    try:
        info = pltpu.get_tpu_info()
        vmem_cap = int(getattr(info, "vmem_capacity_bytes", 128 << 20) or (128 << 20))
    except Exception:  # CPU / interpret / unknown chip
        vmem_cap = 128 << 20
    if vmem_cap <= (96 << 20):        # v7x-class: 64 MiB VMEM per TensorCore
        return 6 << 20, 44 << 20
    return 4 << 20, 48 << 20          # v5e / v6e: 128 MiB VMEM


def _round_up(x, m):
    return ((x + m - 1) // m) * m


def _largest_div(n, mult, cap):
    """Largest divisor of n that is a multiple of `mult` and <= cap (mult | n assumed)."""
    best = mult
    d = mult
    cap = min(cap, n)
    while d <= cap:
        if n % d == 0:
            best = d
        d += mult
    return best


def _pick_tiles(M, K, N, itemsize, budget, sub):
    """Pick padded dims and (tm, tk, tn) so the live VMEM set never exceeds `budget`."""
    Mp = _round_up(M, sub)
    Np = _round_up(N, 128)
    tn = _largest_div(Np, 128, 512)
    tm = _largest_div(Mp, sub, 256)

    def live(tm_, tk_, tn_):
        # double-buffered A, B, out (+ residual) tiles + bias row, + f32 accumulator
        return (2 * (tm_ * tk_ + tk_ * tn_ + 2 * tm_ * tn_ + tn_)) * itemsize + tm_ * tn_ * 4

    k_full = _round_up(K, 8)
    if live(tm, k_full, tn) <= budget:          # full-K block: single reduction step
        return Mp, k_full, Np, tm, k_full, tn

    Kp = _round_up(K, 128)
    tk = _largest_div(Kp, 128, Kp)
    while live(tm, tk, tn) > budget and tk > 128:
        tk = _largest_div(Kp, 128, tk - 128)
    while live(tm, tk, tn) > budget and tm > sub:
        tm = _largest_div(Mp, sub, tm - sub)
    while live(tm, tk, tn) > budget and tn > 128:
        tn = _largest_div(Np, 128, tn - 128)
    return Mp, Kp, Np, tm, tk, tn


# --------------------------------------------------------------------------- fused matmul

def matmul_fused(a, b, *, bias=None, fused_lrelu=False, residual=None,
                 use_pallas=True, block_budget_bytes=None):
    """out = epilogue(a @ b): a (M,K), b (K,N), bias (N,), residual (M,N)."""
    M, K = a.shape
    Kb, N = b.shape
    assert K == Kb

    if not use_pallas:  # pure-JAX reference of the identical math
        out = jnp.dot(a, b, preferred_element_type=jnp.float32,
                      precision=jax.lax.Precision.HIGHEST)
        if bias is not None:
            out = out + bias[None, :].astype(jnp.float32)
        if fused_lrelu:
            out = jnp.where(out >= 0.0, out, NEG_SLOPE * out) * SQRT2
        if residual is not None:
            out = (out + residual.astype(jnp.float32)) * INV_SQRT2
        return out.astype(a.dtype)

    budget, vmem_limit = _hw_budgets()
    if block_budget_bytes is not None:
        budget = block_budget_bytes

    itemsize = jnp.dtype(a.dtype).itemsize
    sub = 8 * max(1, 4 // itemsize)            # dtype-aware sublane multiple
    Mp, Kd, Np, tm, tk, tn = _pick_tiles(M, K, N, itemsize, budget, sub)

    a_p = a if (Mp == M and Kd == K) else jnp.pad(a, ((0, Mp - M), (0, Kd - K)))
    b_p = b if (Kd == K and Np == N) else jnp.pad(b, ((0, Kd - K), (0, Np - N)))

    inputs = [a_p, b_p]
    in_specs = [pl.BlockSpec((tm, tk), lambda i, j, k: (i, k)),
                pl.BlockSpec((tk, tn), lambda i, j, k: (k, j))]
    if bias is not None:
        bias_p = jnp.pad(bias.reshape(1, N).astype(jnp.float32), ((0, 0), (0, Np - N)))
        inputs.append(bias_p)
        in_specs.append(pl.BlockSpec((1, tn), lambda i, j, k: (0, j)))
    if residual is not None:
        r_p = residual if (Mp == M and Np == N) else jnp.pad(
            residual, ((0, Mp - M), (0, Np - N)))
        inputs.append(r_p)
        in_specs.append(pl.BlockSpec((tm, tn), lambda i, j, k: (i, j)))

    kernel = _make_matmul_kernel(bias is not None, bool(fused_lrelu), residual is not None)
    out = pl.pallas_call(
        kernel,
        out_shape=jax.ShapeDtypeStruct((Mp, Np), a.dtype),
        grid_spec=pltpu.PrefetchScalarGridSpec(
            num_scalar_prefetch=0,
            grid=(Mp // tm, Np // tn, Kd // tk),
            in_specs=in_specs,
            out_specs=pl.BlockSpec((tm, tn), lambda i, j, k: (i, j)),
            scratch_shapes=[pltpu.VMEM((tm, tn), jnp.float32)]),
        compiler_params=pltpu.CompilerParams(
            dimension_semantics=("parallel", "parallel", "arbitrary"),
            vmem_limit_bytes=vmem_limit),
    )(*inputs)
    return out[:M, :N]


# --------------------------------------------------------------------------- JAX plumbing

def _blur_nhwc(x, pad0, pad1):
    """upfirdn2d(x, make_kernel([1,3,3,1]), pad=(pad0,pad1)) — separable 4-tap blur."""
    k1 = (1.0 / 8.0, 3.0 / 8.0, 3.0 / 8.0, 1.0 / 8.0)   # outer(k1,k1) == normalized 2D kernel
    B, H, W, C = x.shape
    xp = jnp.pad(x, ((0, 0), (pad0, pad1), (pad0, pad1), (0, 0)))
    Ho = H + pad0 + pad1 - 3
    Wo = W + pad0 + pad1 - 3
    y = sum(k1[t] * xp[:, t:t + Ho, :, :] for t in range(4))
    z = sum(k1[t] * y[:, :, t:t + Wo, :] for t in range(4))
    return z


def _im2col_nhwc(x, k, stride, pad):
    B, H, W, C = x.shape
    if pad:
        x = jnp.pad(x, ((0, 0), (pad, pad), (pad, pad), (0, 0)))
    Hp, Wp = H + 2 * pad, W + 2 * pad
    Ho = (Hp - k) // stride + 1
    Wo = (Wp - k) // stride + 1
    cols = []
    for dy in range(k):
        for dx in range(k):
            cols.append(x[:, dy:dy + stride * (Ho - 1) + 1:stride,
                          dx:dx + stride * (Wo - 1) + 1:stride, :])
    patches = jnp.concatenate(cols, axis=-1) if k > 1 else cols[0]
    return patches.reshape(B * Ho * Wo, k * k * C), (B, Ho, Wo)


def _minibatch_stddev_nhwc(x, stddev_group=4):
    """StyleGAN2 minibatch stddev feature (stddev_feat=1), appended as one channel."""
    B, H, W, C = x.shape
    g = min(B, stddev_group)
    y = x.reshape(g, B // g, H, W, C)
    std = jnp.sqrt(jnp.var(y, axis=0) + 1e-8)                       # (B//g, H, W, C)
    std = jnp.mean(std, axis=(1, 2, 3)).reshape(B // g, 1, 1, 1)
    std = jnp.tile(std, (g, H, W, 1))                               # (B, H, W, 1)
    return jnp.concatenate([x, std], axis=-1)


# --------------------------------------------------------------------------- module pieces

def conv_layer_forward(x, p, *, residual=None, use_pallas=True, block_budget_bytes=None):
    """ConvLayer: [Blur if downsample] -> EqualConv2d -> fused bias + leaky_relu*sqrt(2).
    Bias/activation (and optional ResBlock residual merge) are fused into the matmul."""
    k = p["kernel_size"]
    cout, cin = p["weight"].shape[0], p["weight"].shape[1]
    if p["downsample"]:
        pp = (4 - 2) + (k - 1)                 # len(blur_kernel) - factor + (k - 1)
        x = _blur_nhwc(x, (pp + 1) // 2, pp // 2)
        stride, pad = 2, 0
    else:
        stride, pad = 1, k // 2
    patches, (B, Ho, Wo) = _im2col_nhwc(x, k, stride, pad)
    wmat = jnp.transpose(p["weight"], (2, 3, 1, 0)).reshape(k * k * cin, cout) * p["scale"]
    res2d = None if residual is None else residual.reshape(B * Ho * Wo, cout)
    out = matmul_fused(patches, wmat, bias=p["bias"], fused_lrelu=p["activate"],
                       residual=res2d, use_pallas=use_pallas,
                       block_budget_bytes=block_budget_bytes)
    return out.reshape(B, Ho, Wo, cout)


def equal_linear_forward(x, p, *, use_pallas=True, block_budget_bytes=None):
    wmat = p["weight"].T * p["scale"]
    bias = None if p["bias"] is None else p["bias"] * p["lr_mul"]
    return matmul_fused(x, wmat, bias=bias, fused_lrelu=p["activation"],
                        use_pallas=use_pallas, block_budget_bytes=block_budget_bytes)


# --------------------------------------------------------------------------- params / forward

_DEFAULT_CHANNELS = {4: 512, 8: 512, 16: 512, 32: 512, 64: 512, 128: 256,
                     256: 128, 512: 64, 1024: 32}   # channel_multiplier = 2


def _conv_layer_params(key, cin, cout, k, *, downsample=False, bias=True, activate=True):
    kw, kb = jax.random.split(key)
    w = jax.random.normal(kw, (cout, cin, k, k), dtype=jnp.float32)
    # torch inits biases to zero; small random biases exercise the fused bias-add
    # numerically (forward math is identical).
    b = 0.1 * jax.random.normal(kb, (cout,), dtype=jnp.float32) if bias else None
    return dict(weight=w, scale=1.0 / math.sqrt(cin * k * k), kernel_size=k,
                downsample=downsample, activate=activate, bias=b)


def _equal_linear_params(key, in_dim, out_dim, *, activation=False, lr_mul=1.0,
                         bias_init=0.0):
    kw, kb = jax.random.split(key)
    w = jax.random.normal(kw, (out_dim, in_dim), dtype=jnp.float32) / lr_mul
    b = (jnp.full((out_dim,), bias_init, dtype=jnp.float32)
         + 0.1 * jax.random.normal(kb, (out_dim,), dtype=jnp.float32))
    return dict(weight=w, bias=b, scale=(1.0 / math.sqrt(in_dim)) * lr_mul,
                lr_mul=lr_mul, activation=activation)


def init_discriminator(key, size, *, in_channels=3, channels=None):
    channels = dict(_DEFAULT_CHANNELS if channels is None else channels)
    n_res = int(math.log2(size)) - 2
    keys = iter(jax.random.split(key, 3 * n_res + 4))
    layers = [("conv", _conv_layer_params(next(keys), in_channels, channels[size], 1))]
    in_ch = channels[size]
    for i in range(int(math.log2(size)), 2, -1):
        out_ch = channels[2 ** (i - 1)]
        layers.append(("res", dict(
            conv1=_conv_layer_params(next(keys), in_ch, in_ch, 3),
            conv2=_conv_layer_params(next(keys), in_ch, out_ch, 3, downsample=True),
            skip=_conv_layer_params(next(keys), in_ch, out_ch, 1, downsample=True,
                                    bias=False, activate=False))))
        in_ch = out_ch
    return dict(
        layers=layers,
        final_conv=_conv_layer_params(next(keys), in_ch + 1, channels[4], 3),
        final_linear1=_equal_linear_params(next(keys), channels[4] * 4 * 4, channels[4],
                                           activation=True),
        final_linear2=_equal_linear_params(next(keys), channels[4], 1, activation=False),
    )


def discriminator_forward(params, x_nchw, *, use_pallas=True, block_budget_bytes=None):
    """Discriminator.forward (verification=False, model_mode=None): returns (logits, None)."""
    kw = dict(use_pallas=use_pallas, block_budget_bytes=block_budget_bytes)
    x = jnp.transpose(x_nchw, (0, 2, 3, 1)).astype(jnp.float32)       # NCHW -> NHWC
    for kind, p in params["layers"]:
        if kind == "conv":
            x = conv_layer_forward(x, p, **kw)
        else:   # ResBlock: (conv2(conv1(x)) + skip(x)) / sqrt(2); merge fused into skip matmul
            h = conv_layer_forward(x, p["conv1"], **kw)
            h = conv_layer_forward(h, p["conv2"], **kw)
            x = conv_layer_forward(x, p["skip"], residual=h, **kw)
    x = _minibatch_stddev_nhwc(x)                                      # +1 stddev channel
    x = conv_layer_forward(x, params["final_conv"], **kw)
    B = x.shape[0]
    x = jnp.transpose(x, (0, 3, 1, 2)).reshape(B, -1)                  # NCHW-order flatten
    x = equal_linear_forward(x, params["final_linear1"], **kw)
    x = equal_linear_forward(x, params["final_linear2"], **kw)
    return x, None


# --------------------------------------------------------------------------- test

if __name__ == "__main__":
    key = jax.random.PRNGKey(0)
    k_params, k_x = jax.random.split(key)

    size = 16                                   # smallest resolution the module supports
    batch, in_channels = 2, 3
    # Small channel config for the test (the torch module uses 512 at these resolutions);
    # structure and forward math are identical.
    test_channels = {16: 128, 8: 128, 4: 128}

    params = init_discriminator(k_params, size, in_channels=in_channels,
                                channels=test_channels)
    x = jax.random.normal(k_x, (batch, in_channels, size, size), dtype=jnp.float32)

    out, aux = discriminator_forward(params, x, use_pallas=True)
    out = jax.block_until_ready(out)
    assert out.shape == (batch, 1) and aux is None

    # Pure-JAX reference of the exact same forward math (validates the Pallas matmuls).
    ref, _ = discriminator_forward(params, x, use_pallas=False)
    ref = jax.block_until_ready(ref)
    denom = max(1.0, float(jnp.max(jnp.abs(ref))))
    rel = float(jnp.max(jnp.abs(out - ref))) / denom
    assert rel < 3e-2, f"Pallas vs JAX mismatch: rel max err {rel}"

    # Force a tiny per-block byte budget so the K-tiled accumulator path (multi-step
    # reduction grid axis + pl.when init/epilogue) is exercised as well.
    out_tiled, _ = discriminator_forward(params, x, use_pallas=True,
                                         block_budget_bytes=512 * 1024)
    out_tiled = jax.block_until_ready(out_tiled)
    rel2 = float(jnp.max(jnp.abs(out_tiled - ref))) / denom
    assert rel2 < 3e-2, f"tiled-K path mismatch: rel max err {rel2}"

    print("KERNEL_OK")
</pallas_src>

<mosaic_0001>
module attributes {stable_mosaic.version = 11 : i64} {
  func.func @kernel(%arg0: i32, %arg1: i32, %arg2: i32, %arg3: memref<256x8xf32, #tpu.memory_space<vmem>>, %arg4: memref<8x128xf32, #tpu.memory_space<vmem>>, %arg5: memref<1x128xf32, #tpu.memory_space<vmem>>, %arg6: memref<256x128xf32, #tpu.memory_space<vmem>>, %arg7: memref<256x128xf32, #tpu.memory_space<vmem>>) attributes {dimension_semantics = [#tpu.dimension_semantics<parallel>, #tpu.dimension_semantics<parallel>, #tpu.dimension_semantics<arbitrary>], iteration_bounds = array<i64: 2, 1, 1>, scalar_prefetch = 0 : i64, scratch_operands = 1 : i64, tpu.core_type = #tpu.core_type<tc>, window_params = [{transform_indices = @transform_0, window_bounds = array<i64: 256, 8>}, {transform_indices = @transform_1, window_bounds = array<i64: 8, 128>}, {transform_indices = @transform_2, window_bounds = array<i64: 1, 128>}, {transform_indices = @transform_3, window_bounds = array<i64: 256, 128>}]} {
    %c0_i32 = arith.constant 0 : i32
    %0 = arith.cmpi eq, %arg2, %c0_i32 : i32
    %1 = arith.extui %0 : i1 to i32
    %c0_i32_0 = arith.constant 0 : i32
    %2 = arith.cmpi ne, %1, %c0_i32_0 : i32
    scf.if %2 {
      %cst_10 = arith.constant 0.000000e+00 : f32
      %12 = vector.broadcast %cst_10 : f32 to vector<256x128xf32>
      %c0_11 = arith.constant 0 : index
      %c0_12 = arith.constant 0 : index
      %13 = vector.load %arg7[%c0_11, %c0_12] : memref<256x128xf32, #tpu.memory_space<vmem>>, vector<256x128xf32>
      tpu.vector_store %arg7[%c0_11, %c0_12], %12 {strides = array<i32>} : memref<256x128xf32, #tpu.memory_space<vmem>>, vector<256x128xf32>,
    } else {
    }
    %c0 = arith.constant 0 : index
    %c0_1 = arith.constant 0 : index
    %3 = vector.load %arg7[%c0, %c0_1] : memref<256x128xf32, #tpu.memory_space<vmem>>, vector<256x128xf32>
    %c0_2 = arith.constant 0 : index
    %c0_3 = arith.constant 0 : index
    %4 = vector.load %arg3[%c0_2, %c0_3] : memref<256x8xf32, #tpu.memory_space<vmem>>, vector<256x8xf32>
    %c0_4 = arith.constant 0 : index
    %c0_5 = arith.constant 0 : index
    %5 = vector.load %arg4[%c0_4, %c0_5] : memref<8x128xf32, #tpu.memory_space<vmem>>, vector<8x128xf32>
    %cst = arith.constant dense<0.000000e+00> : vector<256x128xf32>
    %6 = tpu.matmul %4, %5, %cst {dimension_numbers = #tpu.dot_dimension_numbers<[1], [0], [0], [1], [0, 0, 1, 1], [], []>} : vector<256x8xf32>, vector<8x128xf32>, vector<256x128xf32> -> vector<256x128xf32>
    %7 = arith.addf %3, %6 : vector<256x128xf32>
    %c0_6 = arith.constant 0 : index
    %c0_7 = arith.constant 0 : index
    %8 = vector.load %arg7[%c0_6, %c0_7] : memref<256x128xf32, #tpu.memory_space<vmem>>, vector<256x128xf32>
    tpu.vector_store %arg7[%c0_6, %c0_7], %7 {strides = array<i32>} : memref<256x128xf32, #tpu.memory_space<vmem>>, vector<256x128xf32>,
    %c0_i32_8 = arith.constant 0 : i32
    %9 = arith.cmpi eq, %arg2, %c0_i32_8 : i32
    %10 = arith.extui %9 : i1 to i32
    %c0_i32_9 = arith.constant 0 : i32
    %11 = arith.cmpi ne, %10, %c0_i32_9 : i32
    scf.if %11 {
      %c0_10 = arith.constant 0 : index
      %c0_11 = arith.constant 0 : index
      %12 = vector.load %arg7[%c0_10, %c0_11] : memref<256x128xf32, #tpu.memory_space<vmem>>, vector<256x128xf32>
      %c0_12 = arith.constant 0 : index
      %c0_13 = arith.constant 0 : index
      %13 = vector.load %arg5[%c0_12, %c0_13] : memref<1x128xf32, #tpu.memory_space<vmem>>, vector<1x128xf32>
      %14 = vector.broadcast %13 : vector<1x128xf32> to vector<256x128xf32>
      %15 = arith.addf %12, %14 : vector<256x128xf32>
      %cst_14 = arith.constant 0.000000e+00 : f32
      %16 = vector.broadcast %cst_14 : f32 to vector<256x128xf32>
      %17 = arith.cmpf oge, %15, %16 : vector<256x128xf32>
      %cst_15 = arith.constant 2.000000e-01 : f32
      %18 = vector.broadcast %cst_15 : f32 to vector<256x128xf32>
      %19 = arith.mulf %18, %15 : vector<256x128xf32>
      %20 = arith.select %17, %15, %19 : vector<256x128xi1>, vector<256x128xf32>
      %cst_16 = arith.constant 1.41421354 : f32
      %21 = vector.broadcast %cst_16 : f32 to vector<256x128xf32>
      %22 = arith.mulf %20, %21 : vector<256x128xf32>
      %c0_17 = arith.constant 0 : index
      %c0_18 = arith.constant 0 : index
      %23 = vector.load %arg6[%c0_17, %c0_18] : memref<256x128xf32, #tpu.memory_space<vmem>>, vector<256x128xf32>
      tpu.vector_store %arg6[%c0_17, %c0_18], %22 {strides = array<i32>} : memref<256x128xf32, #tpu.memory_space<vmem>>, vector<256x128xf32>,
    } else {
    }
    return
  }
  func.func @transform_0(%arg0: i32, %arg1: i32, %arg2: i32) -> (i32, i32) {
    %c0_i32 = arith.constant 0 : i32
    return %arg0, %arg2 : i32, i32
  }
  func.func @transform_1(%arg0: i32, %arg1: i32, %arg2: i32) -> (i32, i32) {
    %c0_i32 = arith.constant 0 : i32
    return %arg2, %arg1 : i32, i32
  }
  func.func @transform_2(%arg0: i32, %arg1: i32, %arg2: i32) -> (i32, i32) {
    %c0_i32 = arith.constant 0 : i32
    %c0_i32_0 = arith.constant 0 : i32
    return %c0_i32, %arg1 : i32, i32
  }
  func.func @transform_3(%arg0: i32, %arg1: i32, %arg2: i32) -> (i32, i32) {
    %c0_i32 = arith.constant 0 : i32
    return %arg0, %arg1 : i32, i32
  }
}

</mosaic_0001>

<bundles_post_ra>
// kernel: tpu_custom_call.1
= control target key start
LH: loop header
LB: loop body
LE: loop exit
PB: predicated region body
PF: predicated region fallthrough
CT: control target
= control target key end

     0   :  { %8 = vsyncpa [#allocation4], 0  ;;  %s1650_s0 = inlined_call_operand.vmem [shape: f32[512,8], index: 0, kind: input, shape index: {}]   ;;  %s1651_s1 = inlined_call_operand.vmem [shape: f32[8,128], index: 1, kind: input, shape index: {}]   ;;  %s1652_s2 = inlined_call_operand.vmem [shape: f32[1,128], index: 2, kind: input, shape index: {}]   ;;  %s1653_s3 = inlined_call_operand.hbm [shape: f32[512,128], index: 3, kind: output, shape index: {}]  }
   0x1   :  { %10 = vsyncpa [#allocation4 + $0x1], 0  ;;  %s1384_s12 = smov 0   ;;  %s1386_s13 = smov 0  }
   0x2   :  { %s1388_s14 = smov 0   ;;  %s1390_s15 = smov 0  }
   0x3   :  { %s1392_s16 = smov 0   ;;  %s1394_s17 = smov 0  }
   0x4 LB: > { %s1090_s18 = sadd.s32 4294967295, %s1359_s17   ;;  %s1091_s19 = sadd.s32 4294967294, %s1359_s17   ;;  %s1359_s17 = sphi %s1394_s17, %s16_s17   ;;  %s1355_s16 = sphi %s1392_s16, %s1660_s16   ;;  %s1351_s15 = sphi %s1390_s15, %s1659_s15   ;;  %s1347_s14 = sphi %s1388_s14, %s1658_s14   ;;  %s1343_s13 = sphi %s1386_s13, %s1657_s13   ;;  %s1339_s12 = sphi %s1384_s12, %s1656_s12  }
   0x5   : > { %s35_s20 = sadd.s32 1, %s1355_s16  ;;  %s126_s21 = sadd.s32 1, %s1347_s14 }
   0x6   : > { %p37_p0 = scmp.ge.s32.totalorder %s35_s20, 2  ;;  %p136_p1 = scmp.ne.s32.totalorder %s1347_s14, %s1343_s13 }
   0x7   : > { %p137_p2 = scmp.eq.s32.totalorder %s1090_s18, 1  ;;  %p142_p3 = scmp.ne.s32.totalorder %s1343_s13, %s1339_s12 }
   0x8   : > { %s1662_s20 = smov (%p37_p0, %s35_s20), 0  ;;  %p143_p5 = scmp.eq.s32.totalorder %s1091_s19, 1 }
   0x9   : > { %p1424_p4 = por %p137_p2, %p136_p1  ;;  %s121_s23 = ssub.s32 %s1355_s16, %s1662_s20 }
   0xa   : > { %p1096_p6 = scmp.ge.s32.totalorder %s1359_s17, 1  ;;  %p124_p7 = scmp.eq.s32.totalorder %s121_s23, 0 }
   0xb   : > { %p1431_p8 = por %p143_p5, %p142_p3  ;;  %p189_p9 = scmp.lt.s32.totalorder %s1359_s17, 3 }
   0xc   : > { %s1437_s25 = scalar_select %p124_p7, %s1347_s14, %s126_s21  }
   0xd   : > { %p190_p10 = pnand %p1096_p6, %p189_p9 }
   0xe   : > { %v346_v0 = vld [vmem:[%s1651_s1] sm:$0xff] (!%p190_p10)  ;;  %s1098_s28 = sshll.u32 (!%p190_p10), %s1351_s15, 5  ;;  %vm347_vm0 = vcmask (!%p190_p10), 64512   ;;  %s223_s8 = sand.u32 (!%p190_p10), 1, %s1343_s13  }
   0xf   : > { %193 = sbr.rel (%p190_p10) target bundleno = 299 (0x12b), region = 32  ;;  %1172 = vmatprep.subr.mxu0 (!%p190_p10), %v346_v0  ;;  %1222 = vmatprep.subr.mxu1 (!%p190_p10), %v346_v0  ;;  %p227_p11 = scmp.lt.s32.totalorder (!%p190_p10), %s1098_s28, 63  ;;  %v1515_v33 = vld [vmem:[%s1652_s2] ss:$0 sm:$0xff] (!%p190_p10) }
  0x10   : > { %1173 = vmatpush3.msra.mxu0 (!%p190_p10), %v346_v0  ;;  %1223 = vmatpush3.msra.mxu1 (!%p190_p10), %v346_v0  ;;  %s1097_s9 = sshll.u32 (!%p190_p10), %s223_s8, 8  ;;  %s1138_s11 = sshll.u32 (!%p190_p10), %s1351_s15, 12 }
  0x11   : > { %s1526_s10 = scalar_lea.vmem (!%p190_p10), [#allocation3], %s1097_s9  ;;  %s1595_s21 = scalar_lea.hbm (!%p190_p10), %s1653_s3, %s1138_s11 }
  0x12   : > { %s982_s18 = sshll.u32 (!%p190_p10), %s1526_s10, 4  ;;  %s1604_s23 = scalar_lea.sflag (!%p190_p10), [#allocation4], %s223_s8  ;;  %s1597_s18 = int_to_ptr.vmem [resolvable:$true] %s982_s18 }
  0x13   : > { %s1281_s26 = scalar_lea.vmem (!%p190_p10), %s1597_s18, 4096  ;;  %s1361_s27 = smov (!%p190_p10), [#allocation3]  }
  0x14   : > { %p1282_p12 = scmp.ne.s32.totalorder (!%p190_p10), %s1597_s18, %s1281_s26 }
  0x16   : > { %s1664_s28 = smov (!%p227_p11, %s1098_s28), 63  ;;  %p1283_p13 = pnand %p1282_p12, %p1424_p4 }
  0x17   : > { %s1099_s29 = sshll.u32 %s1664_s28, 3  ;;  %s1285_s28 = sshll.u32 %s1361_s27, 4  ;;  %s1286_s28 = int_to_ptr.vmem [resolvable:$false] %s1285_s28 }
  0x18   : > { %s1446_s5 = scalar_lea.vmem %s1650_s0, %s1099_s29  ;;  %p1284_p0 = pneg %p1283_p13 }
  0x19   : > { %v314_v1 = vld [vmem:[%s1446_s5] sm:$0xff]  ;;  %v315_v3 = vld [vmem:[%s1446_s5 + $0x8] sm:$0xff]  ;;  %v316_v5 = vld [vmem:[%s1446_s5 + $0x10] sm:$0xff]  ;;  %s1287_s29 = scalar_lea.vmem %s1286_s28, 8192  ;;  %p1288_p1 = scmp.lt.s32.totalorder %s1597_s18, %s1286_s28 }
  0x1a   : > { %v330_v2 = vld [vmem:[%s1446_s5 + $0x80] sm:$0xff]  ;;  %1174 = vmatprep.mubr.msk.f32.mxu0 %vm347_vm0, %v314_v1  ;;  %v331_v4 = vld [vmem:[%s1446_s5 + $0x88] sm:$0xff]  ;;  %v332_v6 = vld [vmem:[%s1446_s5 + $0x90] sm:$0xff]  ;;  %p1289_p2 = scmp.lt.s32.totalorder %s1287_s29, %s1281_s26 }
  0x1b   : > { %1198 = vmatprep.mubr.msk.f32.mxu1 %vm347_vm0, %v330_v2  ;;  %1175 = vmatmul.mubr.msk.f32.vlgmr.msra.gmra.mrb[0].mxu0 %vm347_vm0, %v315_v3  ;;  %v317_v7 = vld [vmem:[%s1446_s5 + $0x18] sm:$0xff]  ;;  %v318_v9 = vld [vmem:[%s1446_s5 + $0x20] sm:$0xff]  ;;  %v319_v11 = vld [vmem:[%s1446_s5 + $0x28] sm:$0xff] }
  0x1c   : > { %1199 = vmatmul.mubr.msk.f32.vlgmr.msra.gmra.mrb[0].mxu1 %vm347_vm0, %v331_v4  ;;  %1177 = vmatprep.mubr.msk.f32.mxu0 %vm347_vm0, %v316_v5  ;;  %v333_v8 = vld [vmem:[%s1446_s5 + $0x98] sm:$0xff]  ;;  %v334_v10 = vld [vmem:[%s1446_s5 + $0xa0] sm:$0xff]  ;;  %v335_v12 = vld [vmem:[%s1446_s5 + $0xa8] sm:$0xff]  ;;  %p1290_p3 = por %p1289_p2, %p1288_p1 }
  0x1d   : > { %1201 = vmatprep.mubr.msk.f32.mxu1 %vm347_vm0, %v332_v6  ;;  %v320_v13 = vld [vmem:[%s1446_s5 + $0x30] sm:$0xff]  ;;  %v321_v15 = vld [vmem:[%s1446_s5 + $0x38] sm:$0xff]  ;;  %v322_v17 = vld [vmem:[%s1446_s5 + $0x40] sm:$0xff] }
  0x1e   : > { %v336_v14 = vld [vmem:[%s1446_s5 + $0xb0] sm:$0xff]  ;;  %v337_v16 = vld [vmem:[%s1446_s5 + $0xb8] sm:$0xff]  ;;  %v338_v18 = vld [vmem:[%s1446_s5 + $0xc0] sm:$0xff]  ;;  %p1291_p5 = pnand %p1290_p3, %p1284_p0 }
  0x1f   : > { %1178 = vmatmul.mubr.msk.f32.gmra.mrb[2].mxu0 %vm347_vm0, %v317_v7  ;;  %v323_v19 = vld [vmem:[%s1446_s5 + $0x48] sm:$0xff]  ;;  %v324_v21 = vld [vmem:[%s1446_s5 + $0x50] sm:$0xff]  ;;  %v325_v23 = vld [vmem:[%s1446_s5 + $0x58] sm:$0xff] }
  0x20   : > { %1202 = vmatmul.mubr.msk.f32.gmra.mrb[2].mxu1 %vm347_vm0, %v333_v8  ;;  %1180 = vmatprep.mubr.msk.f32.mxu0 %vm347_vm0, %v318_v9  ;;  %v339_v20 = vld [vmem:[%s1446_s5 + $0xc8] sm:$0xff]  ;;  %v340_v22 = vld [vmem:[%s1446_s5 + $0xd0] sm:$0xff]  ;;  %v341_v24 = vld [vmem:[%s1446_s5 + $0xd8] sm:$0xff] }
  0x21   : > { %1204 = vmatprep.mubr.msk.f32.mxu1 %vm347_vm0, %v334_v10  ;;  %v326_v25 = vld [vmem:[%s1446_s5 + $0x60] sm:$0xff]  ;;  %v327_v27 = vld [vmem:[%s1446_s5 + $0x68] sm:$0xff]  ;;  %v328_v29 = vld [vmem:[%s1446_s5 + $0x70] sm:$0xff] }
  0x22   : > { %v342_v26 = vld [vmem:[%s1446_s5 + $0xe0] sm:$0xff]  ;;  %v343_v28 = vld [vmem:[%s1446_s5 + $0xe8] sm:$0xff]  ;;  %v344_v30 = vld [vmem:[%s1446_s5 + $0xf0] sm:$0xff] }
  0x23   : > { %1181 = vmatmul.mubr.msk.f32.gmra.mrb[4].mxu0 %vm347_vm0, %v319_v11  ;;  %v329_v31 = vld [vmem:[%s1446_s5 + $0x78] sm:$0xff] }
  0x24   : > { %1205 = vmatmul.mubr.msk.f32.gmra.mrb[4].mxu1 %vm347_vm0, %v335_v12  ;;  %1183 = vmatprep.mubr.msk.f32.mxu0 %vm347_vm0, %v320_v13  ;;  %v345_v32 = vld [vmem:[%s1446_s5 + $0xf8] sm:$0xff] }
  0x25   : > { %1207 = vmatprep.mubr.msk.f32.mxu1 %vm347_vm0, %v336_v14 }
  0x27   : > { %1184 = vmatmul.mubr.msk.f32.gmra.mrb[6].mxu0 %vm347_vm0, %v321_v15 }
  0x28   : > { %1208 = vmatmul.mubr.msk.f32.gmra.mrb[6].mxu1 %vm347_vm0, %v337_v16  ;;  %1186 = vmatprep.mubr.msk.f32.mxu0 %vm347_vm0, %v322_v17 }
  0x29   : > { %1210 = vmatprep.mubr.msk.f32.mxu1 %vm347_vm0, %v338_v18 }
  0x2b   : > { %1187 = vmatmul.mubr.msk.f32.gmra.mrb[8].mxu0 %vm347_vm0, %v323_v19 }
  0x2c   : > { %1211 = vmatmul.mubr.msk.f32.gmra.mrb[8].mxu1 %vm347_vm0, %v339_v20  ;;  %1189 = vmatprep.mubr.msk.f32.mxu0 %vm347_vm0, %v324_v21 }
  0x2d   : > { %1213 = vmatprep.mubr.msk.f32.mxu1 %vm347_vm0, %v340_v22 }
  0x2f   : > { %1190 = vmatmul.mubr.msk.f32.gmra.mrb[10].mxu0 %vm347_vm0, %v325_v23 }
  0x30   : > { %1214 = vmatmul.mubr.msk.f32.gmra.mrb[10].mxu1 %vm347_vm0, %v341_v24  ;;  %1192 = vmatprep.mubr.msk.f32.mxu0 %vm347_vm0, %v326_v25 }
  0x31   : > { %1216 = vmatprep.mubr.msk.f32.mxu1 %vm347_vm0, %v342_v26 }
  0x33   : > { %1193 = vmatmul.mubr.msk.f32.gmra.mrb[12].mxu0 %vm347_vm0, %v327_v27 }
  0x34   : > { %1217 = vmatmul.mubr.msk.f32.gmra.mrb[12].mxu1 %vm347_vm0, %v343_v28  ;;  %1195 = vmatprep.mubr.msk.f32.mxu0 %vm347_vm0, %v328_v29 }
  0x35   : > { %1219 = vmatprep.mubr.msk.f32.mxu1 %vm347_vm0, %v344_v30 }
  0x37   : > { %1196 = vmatmul.mubr.msk.f32.gmra.mrb[14].mxu0 %vm347_vm0, %v329_v31 }
  0x38   : > { %1220 = vmatmul.mubr.msk.f32.gmra.mrb[14].mxu1 %vm347_vm0, %v345_v32 }
  0xee   : > { %v1176_v34 = vpop.f32.mrb[0].mxu0 }
  0xef   : > { %v1200_v35 = vpop.f32.mrb[0].mxu1  ;;  %v776_v36 = vadd.f32 %v1176_v34, %v1515_v33  ;;  %v510_v38 = vpop.f32.mrb[1].mxu0 }
  0xf0   : > { %v792_v37 = vadd.f32 %v1200_v35, %v1515_v33  ;;  %v590_v39 = vpop.f32.mrb[1].mxu1  ;;  %v775_v40 = vadd.f32 %v1515_v33, %v510_v38 }
  0xf1   : > { %v791_v41 = vadd.f32 %v1515_v33, %v590_v39  ;;  %vm808_vm1 = vcmp.ge.f32.partialorder %v776_v36, 0.0  ;;  %v840_v42 = vmul.f32 0.2, %v776_v36 }
  0xf2   : > { %vm824_vm2 = vcmp.ge.f32.partialorder %v792_v37, 0.0  ;;  %v856_v43 = vmul.f32 0.2, %v792_v37  ;;  %vm807_vm3 = vcmp.ge.f32.partialorder %v775_v40, 0.0  ;;  %v839_v44 = vmul.f32 0.2, %v775_v40 }
  0xf3   : > { %vm823_vm4 = vcmp.ge.f32.partialorder %v791_v41, 0.0  ;;  %v855_v45 = vmul.f32 0.2, %v791_v41  ;;  %v872_v46 = vsel %vm808_vm1, %v776_v36, %v840_v42  ;;  %v1179_v48 = vpop.f32.mrb[2].mxu0  ;;  %v1203_v49 = vpop.f32.mrb[2].mxu1 }
  0xf4   : > { %v888_v47 = vsel %vm824_vm2, %v792_v37, %v856_v43  ;;  %v904_v50 = vmul.f32 1.4142135, %v872_v46  ;;  %v871_v52 = vsel %vm807_vm3, %v775_v40, %v839_v44  ;;  %v520_v54 = vpop.f32.mrb[3].mxu0  ;;  %v600_v55 = vpop.f32.mrb[3].mxu1  ;;  %v778_v58 = vadd.f32 %v1179_v48, %v1515_v33 }
  0xf5   : > { %v920_v51 = vmul.f32 1.4142135, %v888_v47  ;;  %v887_v53 = vsel %vm823_vm4, %v791_v41, %v855_v45  ;;  %v903_v56 = vmul.f32 1.4142135, %v871_v52  ;;  %v794_v59 = vadd.f32 %v1203_v49, %v1515_v33 }
  0xf6   : > { %v919_v57 = vmul.f32 1.4142135, %v887_v53  ;;  %936 = vst [vmem:[%s1526_s10 + $0x8] sm:$0xff] %v904_v50  ;;  %v777_v60 = vadd.f32 %v1515_v33, %v520_v54  ;;  %v793_v61 = vadd.f32 %v1515_v33, %v600_v55  ;;  %v1182_v62 = vpop.f32.mrb[4].mxu0  ;;  %vm810_vm5 = vcmp.ge.f32.partialorder %v778_v58, 0.0 }
  0xf7   : > { %952 = vst [vmem:[%s1526_s10 + $0x88] sm:$0xff] %v920_v51  ;;  %v1206_v63 = vpop.f32.mrb[4].mxu1  ;;  %935 = vst [vmem:[%s1526_s10] sm:$0xff] %v903_v56  ;;  %v842_v0 = vmul.f32 0.2, %v778_v58  ;;  %vm826_vm6 = vcmp.ge.f32.partialorder %v794_v59, 0.0  ;;  %v780_v6 = vadd.f32 %v1182_v62, %v1515_v33  ;;  %v530_v8 = vpop.f32.mrb[5].mxu0 }
  0xf8   : > { %951 = vst [vmem:[%s1526_s10 + $0x80] sm:$0xff] %v919_v57  ;;  %v858_v1 = vmul.f32 0.2, %v794_v59  ;;  %vm809_vm7 = vcmp.ge.f32.partialorder %v777_v60, 0.0  ;;  %v841_v2 = vmul.f32 0.2, %v777_v60  ;;  %v796_v7 = vadd.f32 %v1206_v63, %v1515_v33 }
  0xf9   : > { %vm825_vm8 = vcmp.ge.f32.partialorder %v793_v61, 0.0  ;;  %v857_v3 = vmul.f32 0.2, %v793_v61  ;;  %v874_v4 = vsel %vm810_vm5, %v778_v58, %v842_v0  ;;  %v610_v9 = vpop.f32.mrb[5].mxu1  ;;  %vm812_vm9 = vcmp.ge.f32.partialorder %v780_v6, 0.0 }
  0xfa   : > { %v890_v5 = vsel %vm826_vm6, %v794_v59, %v858_v1  ;;  %v906_v10 = vmul.f32 1.4142135, %v874_v4  ;;  %v873_v12 = vsel %vm809_vm7, %v777_v60, %v841_v2  ;;  %v1185_v14 = vpop.f32.mrb[6].mxu0  ;;  %vm828_vm10 = vcmp.ge.f32.partialorder %v796_v7, 0.0 }
  0xfb   : > { %v922_v11 = vmul.f32 1.4142135, %v890_v5  ;;  %v889_v13 = vsel %vm825_vm8, %v793_v61, %v857_v3  ;;  %v1209_v15 = vpop.f32.mrb[6].mxu1  ;;  %v905_v16 = vmul.f32 1.4142135, %v873_v12  ;;  %v779_v20 = vadd.f32 %v1515_v33, %v530_v8  ;;  %v540_v22 = vpop.f32.mrb[7].mxu0 }
  0xfc   : > { %v921_v17 = vmul.f32 1.4142135, %v889_v13  ;;  %938 = vst [vmem:[%s1526_s10 + $0x18] sm:$0xff] %v906_v10  ;;  %v844_v18 = vmul.f32 0.2, %v780_v6  ;;  %v795_v21 = vadd.f32 %v1515_v33, %v610_v9  ;;  %v620_v23 = vpop.f32.mrb[7].mxu1  ;;  %v782_v24 = vadd.f32 %v1185_v14, %v1515_v33 }
  0xfd   : > { %954 = vst [vmem:[%s1526_s10 + $0x98] sm:$0xff] %v922_v11  ;;  %v860_v19 = vmul.f32 0.2, %v796_v7  ;;  %937 = vst [vmem:[%s1526_s10 + $0x10] sm:$0xff] %v905_v16  ;;  %v798_v25 = vadd.f32 %v1209_v15, %v1515_v33  ;;  %v781_v26 = vadd.f32 %v1515_v33, %v540_v22  ;;  %v797_v27 = vadd.f32 %v1515_v33, %v620_v23 }
  0xfe   : > { %953 = vst [vmem:[%s1526_s10 + $0x90] sm:$0xff] %v921_v17  ;;  %v876_v28 = vsel %vm812_vm9, %v780_v6, %v844_v18  ;;  %vm811_vm11 = vcmp.ge.f32.partialorder %v779_v20, 0.0  ;;  %v843_v30 = vmul.f32 0.2, %v779_v20  ;;  %v1188_v31 = vpop.f32.mrb[8].mxu0  ;;  %vm827_vm12 = vcmp.ge.f32.partialorder %v795_v21, 0.0 }
  0xff   : > { %v892_v29 = vsel %vm828_vm10, %v796_v7, %v860_v19  ;;  %v1212_v32 = vpop.f32.mrb[8].mxu1  ;;  %v908_v34 = vmul.f32 1.4142135, %v876_v28  ;;  %vm814_vm13 = vcmp.ge.f32.partialorder %v782_v24, 0.0  ;;  %v859_v37 = vmul.f32 0.2, %v795_v21 }
 0x100   : > { %v924_v35 = vmul.f32 1.4142135, %v892_v29  ;;  %v875_v36 = vsel %vm811_vm11, %v779_v20, %v843_v30  ;;  %v846_v38 = vmul.f32 0.2, %v782_v24  ;;  %vm830_vm14 = vcmp.ge.f32.partialorder %v798_v25, 0.0  ;;  %v550_v39 = vpop.f32.mrb[9].mxu0 }
 0x101   : > { %940 = vst [vmem:[%s1526_s10 + $0x28] sm:$0xff] %v908_v34  ;;  %v907_v40 = vmul.f32 1.4142135, %v875_v36  ;;  %v862_v41 = vmul.f32 0.2, %v798_v25  ;;  %vm813_vm15 = vcmp.ge.f32.partialorder %v781_v26, 0.0  ;;  %v891_v42 = vsel %vm827_vm12, %v795_v21, %v859_v37 }
 0x102   : > { %956 = vst [vmem:[%s1526_s10 + $0xa8] sm:$0xff] %v924_v35  ;;  %vm829_vm0 = vcmp.ge.f32.partialorder %v797_v27, 0.0  ;;  %v878_v43 = vsel %vm814_vm13, %v782_v24, %v846_v38  ;;  %v845_v44 = vmul.f32 0.2, %v781_v26  ;;  %v861_v45 = vmul.f32 0.2, %v797_v27 }
 0x103   : > { %v630_v46 = vpop.f32.mrb[9].mxu1  ;;  %v1191_v47 = vpop.f32.mrb[10].mxu0  ;;  %939 = vst [vmem:[%s1526_s10 + $0x20] sm:$0xff] %v907_v40  ;;  %v923_v48 = vmul.f32 1.4142135, %v891_v42  ;;  %v894_v50 = vsel %vm830_vm14, %v798_v25, %v862_v41  ;;  %v784_v51 = vadd.f32 %v1188_v31, %v1515_v33  ;;  %v800_v57 = vadd.f32 %v1212_v32, %v1515_v33 }
 0x104   : > { %v910_v49 = vmul.f32 1.4142135, %v878_v43  ;;  %v1215_v52 = vpop.f32.mrb[10].mxu1  ;;  %v560_v53 = vpop.f32.mrb[11].mxu0  ;;  %v926_v54 = vmul.f32 1.4142135, %v894_v50  ;;  %v877_v55 = vsel %vm813_vm15, %v781_v26, %v845_v44  ;;  %v893_v56 = vsel %vm829_vm0, %v797_v27, %v861_v45 }
 0x105   : > { %v640_v58 = vpop.f32.mrb[11].mxu1  ;;  %955 = vst [vmem:[%s1526_s10 + $0xa0] sm:$0xff] %v923_v48  ;;  %v909_v59 = vmul.f32 1.4142135, %v877_v55  ;;  %v925_v60 = vmul.f32 1.4142135, %v893_v56  ;;  %v783_v61 = vadd.f32 %v1515_v33, %v550_v39  ;;  %v799_v0 = vadd.f32 %v1515_v33, %v630_v46 }
 0x106   : > { %942 = vst [vmem:[%s1526_s10 + $0x38] sm:$0xff] %v910_v49  ;;  %vm816_vm1 = vcmp.ge.f32.partialorder %v784_v51, 0.0  ;;  %958 = vst [vmem:[%s1526_s10 + $0xb8] sm:$0xff] %v926_v54  ;;  %v848_v62 = vmul.f32 0.2, %v784_v51  ;;  %vm832_vm2 = vcmp.ge.f32.partialorder %v800_v57, 0.0  ;;  %v786_v3 = vadd.f32 %v1191_v47, %v1515_v33 }
 0x107   : > { %v864_v63 = vmul.f32 0.2, %v800_v57  ;;  %v1194_v1 = vpop.f32.mrb[12].mxu0  ;;  %941 = vst [vmem:[%s1526_s10 + $0x30] sm:$0xff] %v909_v59  ;;  %957 = vst [vmem:[%s1526_s10 + $0xb0] sm:$0xff] %v925_v60  ;;  %vm815_vm3 = vcmp.ge.f32.partialorder %v783_v61, 0.0  ;;  %v802_v4 = vadd.f32 %v1215_v52, %v1515_v33  ;;  %v785_v20 = vadd.f32 %v1515_v33, %v560_v53 }
 0x108   : > { %v847_v2 = vmul.f32 0.2, %v783_v61  ;;  %v1218_v5 = vpop.f32.mrb[12].mxu1  ;;  %v570_v6 = vpop.f32.mrb[13].mxu0  ;;  %v880_v7 = vsel %vm816_vm1, %v784_v51, %v848_v62  ;;  %vm831_vm4 = vcmp.ge.f32.partialorder %v799_v0, 0.0  ;;  %vm818_vm5 = vcmp.ge.f32.partialorder %v786_v3, 0.0 }
 0x109   : > { %v896_v8 = vsel %vm832_vm2, %v800_v57, %v864_v63  ;;  %v863_v9 = vmul.f32 0.2, %v799_v0  ;;  %v650_v10 = vpop.f32.mrb[13].mxu1  ;;  %v912_v11 = vmul.f32 1.4142135, %v880_v7  ;;  %vm834_vm6 = vcmp.ge.f32.partialorder %v802_v4, 0.0 }
 0x10a   : > { %v928_v12 = vmul.f32 1.4142135, %v896_v8  ;;  %v879_v13 = vsel %vm815_vm3, %v783_v61, %v847_v2  ;;  %v850_v16 = vmul.f32 0.2, %v786_v3  ;;  %v1197_v17 = vpop.f32.mrb[14].mxu0  ;;  %v801_v21 = vadd.f32 %v1515_v33, %v640_v58 }
 0x10b   : > { %v911_v14 = vmul.f32 1.4142135, %v879_v13  ;;  %v895_v15 = vsel %vm831_vm4, %v799_v0, %v863_v9  ;;  %944 = vst [vmem:[%s1526_s10 + $0x48] sm:$0xff] %v912_v11  ;;  %v866_v19 = vmul.f32 0.2, %v802_v4  ;;  %v1221_v22 = vpop.f32.mrb[14].mxu1  ;;  %v788_v25 = vadd.f32 %v1194_v1, %v1515_v33 }
 0x10c   : > { %960 = vst [vmem:[%s1526_s10 + $0xc8] sm:$0xff] %v928_v12  ;;  %v927_v18 = vmul.f32 1.4142135, %v895_v15  ;;  %v580_v23 = vpop.f32.mrb[15].mxu0  ;;  %v882_v24 = vsel %vm818_vm5, %v786_v3, %v850_v16  ;;  %v804_v26 = vadd.f32 %v1218_v5, %v1515_v33  ;;  %v787_v27 = vadd.f32 %v1515_v33, %v570_v6  ;;  %v660_v28 = vpop.f32.mrb[15].mxu1 }
 0x10d   : > { %943 = vst [vmem:[%s1526_s10 + $0x40] sm:$0xff] %v911_v14  ;;  %v914_v29 = vmul.f32 1.4142135, %v882_v24  ;;  %v898_v30 = vsel %vm834_vm6, %v802_v4, %v866_v19  ;;  %vm817_vm7 = vcmp.ge.f32.partialorder %v785_v20, 0.0  ;;  %v849_v31 = vmul.f32 0.2, %v785_v20 }
 0x10e   : > { %959 = vst [vmem:[%s1526_s10 + $0xc0] sm:$0xff] %v927_v18  ;;  %v930_v32 = vmul.f32 1.4142135, %v898_v30  ;;  %vm833_vm8 = vcmp.ge.f32.partialorder %v801_v21, 0.0  ;;  %v865_v34 = vmul.f32 0.2, %v801_v21  ;;  %v803_v44 = vadd.f32 %v1515_v33, %v650_v10 }
 0x10f   : > { %vm820_vm9 = vcmp.ge.f32.partialorder %v788_v25, 0.0  ;;  %946 = vst [vmem:[%s1526_s10 + $0x58] sm:$0xff] %v914_v29  ;;  %v881_v35 = vsel %vm817_vm7, %v785_v20, %v849_v31  ;;  %v852_v36 = vmul.f32 0.2, %v788_v25  ;;  %vm836_vm10 = vcmp.ge.f32.partialorder %v804_v26, 0.0 }
 0x110   : > { %v868_v37 = vmul.f32 0.2, %v804_v26  ;;  %962 = vst [vmem:[%s1526_s10 + $0xd8] sm:$0xff] %v930_v32  ;;  %v913_v38 = vmul.f32 1.4142135, %v881_v35  ;;  %v897_v39 = vsel %vm833_vm8, %v801_v21, %v865_v34  ;;  %vm819_vm11 = vcmp.ge.f32.partialorder %v787_v27, 0.0 }
 0x111   : > { %v851_v40 = vmul.f32 0.2, %v787_v27  ;;  %v929_v41 = vmul.f32 1.4142135, %v897_v39  ;;  %v884_v42 = vsel %vm820_vm9, %v788_v25, %v852_v36  ;;  %v790_v48 = vadd.f32 %v1197_v17, %v1515_v33 }
 0x112   : > { %v900_v43 = vsel %vm836_vm10, %v804_v26, %v868_v37  ;;  %945 = vst [vmem:[%s1526_s10 + $0x50] sm:$0xff] %v913_v38  ;;  %v916_v45 = vmul.f32 1.4142135, %v884_v42  ;;  %vm835_vm12 = vcmp.ge.f32.partialorder %v803_v44, 0.0  ;;  %v867_v50 = vmul.f32 0.2, %v803_v44 }
 0x113   : > { %v932_v46 = vmul.f32 1.4142135, %v900_v43  ;;  %v883_v47 = vsel %vm819_vm11, %v787_v27, %v851_v40  ;;  %961 = vst [vmem:[%s1526_s10 + $0xd0] sm:$0xff] %v929_v41  ;;  %v806_v51 = vadd.f32 %v1221_v22, %v1515_v33  ;;  %vm822_vm13 = vcmp.ge.f32.partialorder %v790_v48, 0.0 }
 0x114   : > { %v915_v49 = vmul.f32 1.4142135, %v883_v47  ;;  %948 = vst [vmem:[%s1526_s10 + $0x68] sm:$0xff] %v916_v45  ;;  %v854_v52 = vmul.f32 0.2, %v790_v48  ;;  %v789_v53 = vadd.f32 %v1515_v33, %v580_v23  ;;  %v805_v54 = vadd.f32 %v1515_v33, %v660_v28 }
 0x115   : > { %964 = vst [vmem:[%s1526_s10 + $0xe8] sm:$0xff] %v932_v46  ;;  %v899_v55 = vsel %vm835_vm12, %v803_v44, %v867_v50  ;;  %vm838_vm14 = vcmp.ge.f32.partialorder %v806_v51, 0.0  ;;  %v870_v56 = vmul.f32 0.2, %v806_v51 }
 0x116   : > { %947 = vst [vmem:[%s1526_s10 + $0x60] sm:$0xff] %v915_v49  ;;  %v931_v57 = vmul.f32 1.4142135, %v899_v55  ;;  %v886_v58 = vsel %vm822_vm13, %v790_v48, %v854_v52  ;;  %vm821_vm15 = vcmp.ge.f32.partialorder %v789_v53, 0.0  ;;  %v853_v59 = vmul.f32 0.2, %v789_v53 }
 0x117   : > { %v918_v60 = vmul.f32 1.4142135, %v886_v58  ;;  %v902_v61 = vsel %vm838_vm14, %v806_v51, %v870_v56  ;;  %vm837_vm0 = vcmp.ge.f32.partialorder %v805_v54, 0.0  ;;  %v869_v62 = vmul.f32 0.2, %v805_v54 }
 0x118   : > { %963 = vst [vmem:[%s1526_s10 + $0xe0] sm:$0xff] %v931_v57  ;;  %v934_v33 = vmul.f32 1.4142135, %v902_v61  ;;  %v885_v63 = vsel %vm821_vm15, %v789_v53, %v853_v59 }
 0x119   : > { %950 = vst [vmem:[%s1526_s10 + $0x78] sm:$0xff] %v918_v60  ;;  %v917_v0 = vmul.f32 1.4142135, %v885_v63  ;;  %v901_v1 = vsel %vm837_vm0, %v805_v54, %v869_v62 }
 0x11a   : > { %966 = vst [vmem:[%s1526_s10 + $0xf8] sm:$0xff] %v934_v33  ;;  %v933_v2 = vmul.f32 1.4142135, %v901_v1 }
 0x11b   : > { %949 = vst [vmem:[%s1526_s10 + $0x70] sm:$0xff] %v917_v0 }
 0x11c   : > { %965 = vst [vmem:[%s1526_s10 + $0xf0] sm:$0xff] %v933_v2 }
 0x11d   : > { %1294 = shalt.err (!%p1291_p5)
}
 0x11e   : > { %s1295_s30 = scalar_lea.hbm %s1595_s21, 4096  ;;  %s1299_s6 = scalar_lea.hbm %s1653_s3, 8192 }
 0x11f   : > { %p1296_p6 = scmp.ne.s32.totalorder %s1595_s21, %s1295_s30  ;;  %p1300_p10 = scmp.lt.u32.totalorder %s1595_s21, %s1653_s3 }
 0x120   : > { %p1301_p11 = scmp.lt.u32.totalorder %s1299_s6, %s1295_s30  ;;  %p1303_p13 = scmp.lt.u32.totalorder %s1295_s30, %s1595_s21 }
 0x121   : > { %p1297_p7 = pnand %p1296_p6, %p1424_p4 }
 0x122   : > { %p1302_p12 = por %p1301_p11, %p1300_p10 }
 0x123   : > { %p1298_p9 = pneg %p1297_p7 }
 0x124   : > { %p1304_p0 = por %p1303_p13, %p1302_p12 }
 0x126   : > { %p1305_p1 = pnand %p1304_p0, %p1298_p9 }
 0x128   : > { %1308 = shalt.err (!%p1305_p1)
}
 0x129   : > { %s1362_s9 = smov 128   ;;  %s1363_s10 = smov 8  }
 0x12a   : > { %1224 = dma.vmem_to_hbm [thread:$0]  (%p1424_p4), %s1597_s18, 4096, %s1595_s21, %s1604_s23, %s1362_s9, %s1362_s9, %s1363_s10  }
 0x12b PF: > { %p1230_p2 = scmp.ge.s32.totalorder %s1359_s17, 2  ;;  %s997_s11 = sand.u32 1, %s1339_s12  }
 0x12c   : > { %s998_s15 = scalar_lea.sflag [#allocation4], %s997_s11 }
 0x12d   : > { %p1227_p3 = pnand %p1230_p2, %p1431_p8 }
 0x12f   : > { %1334 = dma.done.wait (!%p1227_p3), %s998_s15, 4096  }
 0x130   : > { %1336 = vsyncadd (!%p1227_p3), %s998_s15, 4294963200  ;;  %s16_s17 = sadd.s32 1, %s1359_s17   ;;  %s1656_s12 = smov %s1343_s13 }
 0x131   : > { %p13_p5 = scmp.ge.s32.totalorder %s16_s17, 4   ;;  %s1657_s13 = smov %s1347_s14 }
 0x132   : > { %s1658_s14 = smov %s1437_s25  ;;  %s1659_s15 = smov %s1355_s16 }
 0x133   : > { %s1660_s16 = smov %s1662_s20  ;;  %15 = sbr.rel (!%p13_p5) target bundleno = 4 (0x4), region = 81 }
 0x13a   :  { %1003 = vsyncpa [#allocation4], 1 }
 0x13b   :  { %1005 = vsyncpa [#allocation4 + $0x1], 1 }

</bundles_post_ra>
